<compile_context>
chip_gen: v5e
topology: v5e:2x2
jax: 0.10.0
libtpu: 0.0.40
codegen_flags: <defaults>
</compile_context>

<pallas_src>
import math

import jax
import jax.numpy as jnp
from jax.experimental import pallas as pl
from jax.experimental.pallas import tpu as pltpu


def _round_up(v, m):
    return ((v + m - 1) // m) * m


def _vmem_capacity_bytes():
    """Physical VMEM of the current TPU generation (fallback: v7x's 64 MiB)."""
    try:
        return int(pltpu.get_tpu_info().vmem_capacity_bytes)
    except Exception:
        return 64 << 20


def _make_dcm_kernel(group_matmul, out_dtype):
    """group_matmul=True -> per-image reductions via block-of-ones MXU matmul
    (needed when G > 1 images are packed along sublanes)."""

    def body(x_ref, y_ref, w_ref, b_ref, m_ref, xo_ref, yo_ref):
        x = x_ref[...].astype(jnp.float32)          # [R, tp]
        y = y_ref[...].astype(jnp.float32)
        w = w_ref[...]                               # [R, R] block-diag, BN folded
        b = b_ref[...]                               # [R, 1]  BN folded bias

        # --- dconv branch: 1x1 conv (MXU) + LeakyReLU(0.01) + sigmoid ---
        d = jnp.abs(x - y)
        z = jnp.dot(w, d, preferred_element_type=jnp.float32,
                    precision=jax.lax.Precision.HIGHEST) + b
        z = jnp.where(z >= 0.0, z, 0.01 * z)
        dif1 = pl.reciprocal(1.0 + jnp.exp(-z))      # exp + reciprocal -> EUP

        # --- per-pixel cosine similarity over each image's channels ---
        pxy = x * y
        pxx = x * x
        pyy = y * y
        if group_matmul:
            # block-of-ones matmul = per-image channel sum, already broadcast
            # back to that image's sublanes (MXU is idle in this kernel).
            m = m_ref[...]                           # [R, R]
            dot_xy = jnp.dot(m, pxy, preferred_element_type=jnp.float32,
                             precision=jax.lax.Precision.HIGHEST)
            ss = (jnp.dot(m, pxx, preferred_element_type=jnp.float32,
                          precision=jax.lax.Precision.HIGHEST) *
                  jnp.dot(m, pyy, preferred_element_type=jnp.float32,
                          precision=jax.lax.Precision.HIGHEST))
        else:
            dot_xy = jnp.sum(pxy, axis=0, keepdims=True)     # [1, tp]
            ss = (jnp.sum(pxx, axis=0, keepdims=True) *
                  jnp.sum(pyy, axis=0, keepdims=True))

        # one EUP rsqrt instead of 2 sqrt + divide; 1e-16 ~ (1e-8)^2 guards the
        # degenerate zero-norm case (matches the reference eps far below 1e-5
        # for non-degenerate pixels).
        inv_nm = jax.lax.rsqrt(ss + 1e-16)
        sim = (dot_xy * inv_nm + 1.0) * 0.5
        s = dif1 * (sim * (1.0 - sim))               # shared factor for both outs
        xo_ref[...] = (x * s).astype(out_dtype)
        yo_ref[...] = (y * s).astype(out_dtype)

    if group_matmul:
        return body

    def body_no_m(x_ref, y_ref, w_ref, b_ref, xo_ref, yo_ref):
        return body(x_ref, y_ref, w_ref, b_ref, None, xo_ref, yo_ref)

    return body_no_m


def dcm_forward(x_nchw, y_nchw, conv_w, conv_b, bn_gamma, bn_beta, bn_mean,
                bn_var, bn_eps=1e-5, tile_pix=None, out_dtype=None):
    """x_nchw, y_nchw: [B, C, H, W] (f32 or bf16).  Returns (out_x, out_y) NCHW."""
    B, C, H, W = x_nchw.shape
    HW = H * W
    in_dtype = x_nchw.dtype
    if out_dtype is None:
        out_dtype = in_dtype

    # ---- fold eval-mode BatchNorm into the 1x1 conv ----
    bn_scale = (bn_gamma / jnp.sqrt(bn_var + bn_eps)).astype(jnp.float32)
    w_eff = conv_w.astype(jnp.float32) * bn_scale[:, None]          # [C, C]
    b_eff = (conv_b.astype(jnp.float32) - bn_mean) * bn_scale + bn_beta

    # ---- sublane packing: G images per block so R = G*C is a multiple of 8 ----
    G = 8 // math.gcd(C, 8)
    R = G * C
    Bp = _round_up(B, G)                       # pad batch with zero images if needed
    row_blocks = Bp // G

    w_bd = jnp.kron(jnp.eye(G, dtype=jnp.float32), w_eff)           # [R, R]
    b_bd = jnp.tile(b_eff, G).reshape(R, 1)                         # [R, 1]
    m_grp = jnp.kron(jnp.eye(G, dtype=jnp.float32),
                     jnp.ones((C, C), jnp.float32))                 # [R, R]

    # ---- tile sizing from the real VMEM capacity ----
    cap = _vmem_capacity_bytes()
    vmem_limit = min(int(cap * 0.85), 100 << 20)   # ~100 MiB v5e/v6e, ~54 MiB v7x
    buf_budget = int(vmem_limit * 0.80)            # headroom for params/scratch
    in_isz = jnp.dtype(in_dtype).itemsize
    out_isz = jnp.dtype(out_dtype).itemsize

    hw128 = _round_up(HW, 128)
    if tile_pix is None:
        # 2 input + 2 output streams, each double-buffered.
        t = buf_budget // (4 * R * (in_isz + out_isz))
        t = max(128, (t // 128) * 128)
        t = min(t, hw128)
        # keep >= ~4 total grid steps so megacore ("parallel") sharding has work.
        want_pix = max(1, -(-4 // row_blocks))
        want_pix = min(want_pix, hw128 // 128)
        t = min(t, max(128, (hw128 // want_pix) // 128 * 128))
        tile_pix = t
    assert tile_pix % 128 == 0, "pixel tile must be a multiple of 128 lanes"

    hw_pad = _round_up(HW, tile_pix)
    n_pix = hw_pad // tile_pix

    # ---- free reshape to [B*C, H*W]; zero-pad ragged batch / pixels ----
    x2 = x_nchw.reshape(B * C, HW)
    y2 = y_nchw.reshape(B * C, HW)
    pad_rows = Bp * C - B * C
    pad_cols = hw_pad - HW
    if pad_rows or pad_cols:
        x2 = jnp.pad(x2, ((0, pad_rows), (0, pad_cols)))
        y2 = jnp.pad(y2, ((0, pad_rows), (0, pad_cols)))

    grid = (row_blocks, n_pix)
    xy_spec = pl.BlockSpec((R, tile_pix), lambda gi, pi: (gi, pi))
    w_spec = pl.BlockSpec((R, R), lambda gi, pi: (0, 0))
    b_spec = pl.BlockSpec((R, 1), lambda gi, pi: (0, 0))

    group_matmul = G > 1
    kernel = _make_dcm_kernel(group_matmul=group_matmul, out_dtype=out_dtype)

    in_specs = [xy_spec, xy_spec, w_spec, b_spec]
    args = [x2, y2, w_bd, b_bd]
    if group_matmul:
        in_specs.append(w_spec)
        args.append(m_grp)

    out_x2, out_y2 = pl.pallas_call(
        kernel,
        out_shape=(jax.ShapeDtypeStruct((Bp * C, hw_pad), out_dtype),
                   jax.ShapeDtypeStruct((Bp * C, hw_pad), out_dtype)),
        grid_spec=pltpu.PrefetchScalarGridSpec(
            num_scalar_prefetch=0,
            grid=grid,
            in_specs=in_specs,
            out_specs=[xy_spec, xy_spec],
        ),
        compiler_params=pltpu.CompilerParams(
            dimension_semantics=("parallel", "parallel"),
            vmem_limit_bytes=vmem_limit,
        ),
    )(*args)

    out_x = out_x2[:B * C, :HW].reshape(B, C, H, W)
    out_y = out_y2[:B * C, :HW].reshape(B, C, H, W)
    return out_x, out_y


def _reference(x, y, conv_w, conv_b, bn_gamma, bn_beta, bn_mean, bn_var,
               bn_eps=1e-5):
    """Pure-JAX reference mirroring the PyTorch forward (eval-mode BN)."""
    d = jnp.abs(x - y)                                               # [B,C,H,W]
    z = jnp.einsum('oc,bchw->bohw', conv_w, d) + conv_b[None, :, None, None]
    z = (z - bn_mean[None, :, None, None]) / jnp.sqrt(bn_var + bn_eps)[None, :, None, None]
    z = z * bn_gamma[None, :, None, None] + bn_beta[None, :, None, None]
    z = jnp.where(z >= 0, z, 0.01 * z)
    dif1 = jax.nn.sigmoid(z)
    dot = jnp.sum(x * y, axis=1, keepdims=True)
    nx = jnp.sqrt(jnp.sum(x * x, axis=1, keepdims=True))
    ny = jnp.sqrt(jnp.sum(y * y, axis=1, keepdims=True))
    sim = (dot / (nx * ny + 1e-8) + 1.0) / 2.0
    dissim = 1.0 - sim
    return x * sim * dif1 * dissim, y * sim * dif1 * dissim


if __name__ == "__main__":
    B, C, H, W = 2, 4, 16, 16
    key = jax.random.PRNGKey(0)
    k1, k2, k3, k4 = jax.random.split(key, 4)

    x = jax.random.normal(k1, (B, C, H, W), dtype=jnp.float32)
    y = jax.random.normal(k2, (B, C, H, W), dtype=jnp.float32)

    # dconv parameters: Conv2d(C, C, 1) + BatchNorm2d(C) (PyTorch default BN stats)
    conv_w = 0.1 * jax.random.normal(k3, (C, C), dtype=jnp.float32)   # [C_out, C_in]
    conv_b = 0.1 * jax.random.normal(k4, (C,), dtype=jnp.float32)
    bn_gamma = jnp.ones((C,), jnp.float32)
    bn_beta = jnp.zeros((C,), jnp.float32)
    bn_mean = jnp.zeros((C,), jnp.float32)
    bn_var = jnp.ones((C,), jnp.float32)

    out_x, out_y = dcm_forward(x, y, conv_w, conv_b, bn_gamma, bn_beta,
                               bn_mean, bn_var)
    jax.block_until_ready((out_x, out_y))

    ref_x, ref_y = _reference(x, y, conv_w, conv_b, bn_gamma, bn_beta,
                              bn_mean, bn_var)
    assert jnp.allclose(out_x, ref_x, atol=2e-5, rtol=2e-5)
    assert jnp.allclose(out_y, ref_y, atol=2e-5, rtol=2e-5)

    print("KERNEL_OK")
</pallas_src>

<mosaic_0001>
module attributes {stable_mosaic.version = 11 : i64} {
  func.func @body(%arg0: i32, %arg1: i32, %arg2: memref<8x128xf32, #tpu.memory_space<vmem>>, %arg3: memref<8x128xf32, #tpu.memory_space<vmem>>, %arg4: memref<8x8xf32, #tpu.memory_space<vmem>>, %arg5: memref<8x1xf32, #tpu.memory_space<vmem>>, %arg6: memref<8x8xf32, #tpu.memory_space<vmem>>, %arg7: memref<8x128xf32, #tpu.memory_space<vmem>>, %arg8: memref<8x128xf32, #tpu.memory_space<vmem>>) attributes {dimension_semantics = [#tpu.dimension_semantics<parallel>, #tpu.dimension_semantics<parallel>], iteration_bounds = array<i64: 1, 2>, scalar_prefetch = 0 : i64, scratch_operands = 0 : i64, tpu.core_type = #tpu.core_type<tc>, window_params = [{transform_indices = @transform_0, window_bounds = array<i64: 8, 128>}, {transform_indices = @transform_1, window_bounds = array<i64: 8, 128>}, {pipeline_mode = #tpu.pipeline_mode<synchronous>, transform_indices = @transform_2, window_bounds = array<i64: 8, 8>}, {pipeline_mode = #tpu.pipeline_mode<synchronous>, transform_indices = @transform_3, window_bounds = array<i64: 8, 1>}, {pipeline_mode = #tpu.pipeline_mode<synchronous>, transform_indices = @transform_4, window_bounds = array<i64: 8, 8>}, {transform_indices = @transform_5, window_bounds = array<i64: 8, 128>}, {transform_indices = @transform_6, window_bounds = array<i64: 8, 128>}]} {
    %c0 = arith.constant 0 : index
    %c0_0 = arith.constant 0 : index
    %0 = vector.load %arg2[%c0, %c0_0] : memref<8x128xf32, #tpu.memory_space<vmem>>, vector<8x128xf32>
    %c0_1 = arith.constant 0 : index
    %c0_2 = arith.constant 0 : index
    %1 = vector.load %arg3[%c0_1, %c0_2] : memref<8x128xf32, #tpu.memory_space<vmem>>, vector<8x128xf32>
    %c0_3 = arith.constant 0 : index
    %c0_4 = arith.constant 0 : index
    %2 = vector.load %arg4[%c0_3, %c0_4] : memref<8x8xf32, #tpu.memory_space<vmem>>, vector<8x8xf32>
    %c0_5 = arith.constant 0 : index
    %c0_6 = arith.constant 0 : index
    %3 = vector.load %arg5[%c0_5, %c0_6] : memref<8x1xf32, #tpu.memory_space<vmem>>, vector<8x1xf32>
    %4 = arith.subf %0, %1 : vector<8x128xf32>
    %5 = math.absf %4 : vector<8x128xf32>
    %cst = arith.constant dense<0.000000e+00> : vector<8x128xf32>
    %6 = tpu.matmul %2, %5, %cst {dimension_numbers = #tpu.dot_dimension_numbers<[1], [0], [0], [1], [0, 0, 1, 1], [], []>, precision = #tpu.contract_precision<fp32>} : vector<8x8xf32>, vector<8x128xf32>, vector<8x128xf32> -> vector<8x128xf32>
    %7 = vector.broadcast %3 : vector<8x1xf32> to vector<8x128xf32>
    %8 = arith.addf %6, %7 : vector<8x128xf32>
    %cst_7 = arith.constant 0.000000e+00 : f32
    %9 = vector.broadcast %cst_7 : f32 to vector<8x128xf32>
    %10 = arith.cmpf oge, %8, %9 : vector<8x128xf32>
    %cst_8 = arith.constant 0.00999999977 : f32
    %11 = vector.broadcast %cst_8 : f32 to vector<8x128xf32>
    %12 = arith.mulf %11, %8 : vector<8x128xf32>
    %13 = arith.select %10, %8, %12 : vector<8x128xi1>, vector<8x128xf32>
    %cst_9 = arith.constant 0.000000e+00 : f32
    %14 = vector.broadcast %cst_9 : f32 to vector<8x128xf32>
    %15 = arith.subf %14, %13 : vector<8x128xf32>
    %16 = math.exp %15 : vector<8x128xf32>
    %cst_10 = arith.constant 1.000000e+00 : f32
    %17 = vector.broadcast %cst_10 : f32 to vector<8x128xf32>
    %18 = arith.addf %17, %16 : vector<8x128xf32>
    %19 = tpu.reciprocal %18 : vector<8x128xf32> -> vector<8x128xf32>
    %20 = arith.mulf %0, %1 : vector<8x128xf32>
    %21 = arith.mulf %0, %0 : vector<8x128xf32>
    %22 = arith.mulf %1, %1 : vector<8x128xf32>
    %c0_11 = arith.constant 0 : index
    %c0_12 = arith.constant 0 : index
    %23 = vector.load %arg6[%c0_11, %c0_12] : memref<8x8xf32, #tpu.memory_space<vmem>>, vector<8x8xf32>
    %cst_13 = arith.constant dense<0.000000e+00> : vector<8x128xf32>
    %24 = tpu.matmul %23, %20, %cst_13 {dimension_numbers = #tpu.dot_dimension_numbers<[1], [0], [0], [1], [0, 0, 1, 1], [], []>, precision = #tpu.contract_precision<fp32>} : vector<8x8xf32>, vector<8x128xf32>, vector<8x128xf32> -> vector<8x128xf32>
    %cst_14 = arith.constant dense<0.000000e+00> : vector<8x128xf32>
    %25 = tpu.matmul %23, %21, %cst_14 {dimension_numbers = #tpu.dot_dimension_numbers<[1], [0], [0], [1], [0, 0, 1, 1], [], []>, precision = #tpu.contract_precision<fp32>} : vector<8x8xf32>, vector<8x128xf32>, vector<8x128xf32> -> vector<8x128xf32>
    %cst_15 = arith.constant dense<0.000000e+00> : vector<8x128xf32>
    %26 = tpu.matmul %23, %22, %cst_15 {dimension_numbers = #tpu.dot_dimension_numbers<[1], [0], [0], [1], [0, 0, 1, 1], [], []>, precision = #tpu.contract_precision<fp32>} : vector<8x8xf32>, vector<8x128xf32>, vector<8x128xf32> -> vector<8x128xf32>
    %27 = arith.mulf %25, %26 : vector<8x128xf32>
    %cst_16 = arith.constant 1.000000e-16 : f32
    %28 = vector.broadcast %cst_16 : f32 to vector<8x128xf32>
    %29 = arith.addf %27, %28 : vector<8x128xf32>
    %30 = math.rsqrt %29 : vector<8x128xf32>
    %31 = arith.mulf %24, %30 : vector<8x128xf32>
    %cst_17 = arith.constant 1.000000e+00 : f32
    %32 = vector.broadcast %cst_17 : f32 to vector<8x128xf32>
    %33 = arith.addf %31, %32 : vector<8x128xf32>
    %cst_18 = arith.constant 5.000000e-01 : f32
    %34 = vector.broadcast %cst_18 : f32 to vector<8x128xf32>
    %35 = arith.mulf %33, %34 : vector<8x128xf32>
    %cst_19 = arith.constant 1.000000e+00 : f32
    %36 = vector.broadcast %cst_19 : f32 to vector<8x128xf32>
    %37 = arith.subf %36, %35 : vector<8x128xf32>
    %38 = arith.mulf %35, %37 : vector<8x128xf32>
    %39 = arith.mulf %19, %38 : vector<8x128xf32>
    %40 = arith.mulf %0, %39 : vector<8x128xf32>
    %c0_20 = arith.constant 0 : index
    %c0_21 = arith.constant 0 : index
    %41 = vector.load %arg7[%c0_20, %c0_21] : memref<8x128xf32, #tpu.memory_space<vmem>>, vector<8x128xf32>
    tpu.vector_store %arg7[%c0_20, %c0_21], %40 {strides = array<i32>} : memref<8x128xf32, #tpu.memory_space<vmem>>, vector<8x128xf32>,
    %42 = arith.mulf %1, %39 : vector<8x128xf32>
    %c0_22 = arith.constant 0 : index
    %c0_23 = arith.constant 0 : index
    %43 = vector.load %arg8[%c0_22, %c0_23] : memref<8x128xf32, #tpu.memory_space<vmem>>, vector<8x128xf32>
    tpu.vector_store %arg8[%c0_22, %c0_23], %42 {strides = array<i32>} : memref<8x128xf32, #tpu.memory_space<vmem>>, vector<8x128xf32>,
    return
  }
  func.func @transform_0(%arg0: i32, %arg1: i32) -> (i32, i32) {
    %c0_i32 = arith.constant 0 : i32
    return %arg0, %arg1 : i32, i32
  }
  func.func @transform_1(%arg0: i32, %arg1: i32) -> (i32, i32) {
    %c0_i32 = arith.constant 0 : i32
    return %arg0, %arg1 : i32, i32
  }
  func.func @transform_2(%arg0: i32, %arg1: i32) -> (i32, i32) {
    %c0_i32 = arith.constant 0 : i32
    %c0_i32_0 = arith.constant 0 : i32
    %c0_i32_1 = arith.constant 0 : i32
    return %c0_i32, %c0_i32_0 : i32, i32
  }
  func.func @transform_3(%arg0: i32, %arg1: i32) -> (i32, i32) {
    %c0_i32 = arith.constant 0 : i32
    %c0_i32_0 = arith.constant 0 : i32
    %c0_i32_1 = arith.constant 0 : i32
    return %c0_i32, %c0_i32_0 : i32, i32
  }
  func.func @transform_4(%arg0: i32, %arg1: i32) -> (i32, i32) {
    %c0_i32 = arith.constant 0 : i32
    %c0_i32_0 = arith.constant 0 : i32
    %c0_i32_1 = arith.constant 0 : i32
    return %c0_i32, %c0_i32_0 : i32, i32
  }
  func.func @transform_5(%arg0: i32, %arg1: i32) -> (i32, i32) {
    %c0_i32 = arith.constant 0 : i32
    return %arg0, %arg1 : i32, i32
  }
  func.func @transform_6(%arg0: i32, %arg1: i32) -> (i32, i32) {
    %c0_i32 = arith.constant 0 : i32
    return %arg0, %arg1 : i32, i32
  }
}

</mosaic_0001>

<bundles_post_ra>
// kernel: tpu_custom_call.1
= control target key start
LH: loop header
LB: loop body
LE: loop exit
PB: predicated region body
PF: predicated region fallthrough
CT: control target
= control target key end

     0   :  { %s1784_s0 = inlined_call_operand.hbm [shape: f32[8,256], index: 0, kind: input, shape index: {}]   ;;  %s1785_s1 = inlined_call_operand.hbm [shape: f32[8,256], index: 1, kind: input, shape index: {}]   ;;  %s1786_s2 = inlined_call_operand.vmem [shape: f32[8,8], index: 2, kind: input, shape index: {}]   ;;  %s1787_s3 = inlined_call_operand.vmem [shape: f32[8,1], index: 3, kind: input, shape index: {}]   ;;  %s1788_s4 = inlined_call_operand.hbm [shape: f32[8,8], index: 4, kind: input, shape index: {}]   ;;  %s1789_s5 = inlined_call_operand.hbm [shape: f32[8,256], index: 5, kind: output, shape index: {0}]   ;;  %s1790_s6 = inlined_call_operand.hbm [shape: f32[8,256], index: 6, kind: output, shape index: {1}]  }
   0x1   :  { %1797 = sst [smem:[#allocation22_spill]] %s1788_s4 }
   0x2   :  { %12 = vsyncpa [#allocation3], 0 }
   0x3   :  { %14 = vsyncpa [#allocation3 + $0x1], 0 }
   0x4   :  { %15 = vsyncpa [#allocation6], 0 }
   0x5   :  { %17 = vsyncpa [#allocation6 + $0x1], 0 }
   0x6   :  { %18 = vsyncpa [#allocation4], 0 }
   0x7   :  { %20 = vsyncpa [#allocation4 + $0x1], 0 }
   0x8   :  { %21 = vsyncpa [#allocation10], 0 }
   0x9   :  { %23 = vsyncpa [#allocation10 + $0x1], 0  ;;  %s1559_s21 = smov 0   ;;  %s1561_s22 = smov 0  }
   0xa   :  { %s1563_s23 = smov 0   ;;  %s1565_s24 = smov 0  }
   0xb   :  { %s1567_s25 = smov 0   ;;  %s1569_s26 = smov 0  }
   0xc LB: > { %1798 = sst [smem:[#allocation16_spill]] %s1500_s21  ;;  %s1590_s27 = sadd.s32 4294967295, %s1520_s26   ;;  %s1520_s26 = sphi %s1569_s26, %s29_s26   ;;  %s1516_s25 = sphi %s1567_s25, %s1815_s25   ;;  %s1512_s24 = sphi %s1565_s24, %s1814_s24   ;;  %s1508_s23 = sphi %s1563_s23, %s1818_s23   ;;  %s1504_s22 = sphi %s1561_s22, %s1817_s22   ;;  %s1500_s21 = sphi %s1559_s21, %s1816_s21  }
   0xd   : > { %1799 = sst [smem:[#allocation17_spill]] %s1516_s25  ;;  %s1197_s28 = sadd.s32 4294967294, %s1520_s26  }
   0xe   : > { %p63_p0 = scmp.ne.s32.totalorder %s1504_s22, %s1500_s21  ;;  %p64_p1 = scmp.eq.s32.totalorder %s1590_s27, 0 }
   0xf   : > { %p180_p2 = scmp.eq.s32.totalorder %s1590_s27, 1  ;;  %p186_p3 = scmp.eq.s32.totalorder %s1197_s28, 1 }
  0x10   : > { %p1599_p4 = por %p64_p1, %p63_p0  ;;  %p1198_p5 = scmp.ge.s32.totalorder %s1520_s26, 1 }
  0x11   : > { %p1604_p6 = por %p186_p3, %p63_p0  ;;  %p221_p7 = scmp.lt.s32.totalorder %s1520_s26, 3 }
  0x12   : > { %s1803_s4 = sld [smem:[#allocation22_spill]]  ;;  %p1200_p9 = scmp.ge.s32.totalorder %s1520_s26, 2 }
  0x13   : > { %s1801_s30 = scalar_select %p1604_p6, 1, 0 }
  0x14   : > { %p1612_p8 = pnand %p1198_p5, %p221_p7  ;;  %s1522_s11 = smov [#allocation7]  }
  0x15   : > { %1802 = sst [smem:[#allocation18_spill]] %s1801_s30  ;;  %s241_s12 = sshll.u32 %s1522_s11, 4  ;;  %s242_s12 = int_to_ptr.vmem [resolvable:$true] %s241_s12 }
  0x16   : > { %p1229_p10 = pneg %p1612_p8  ;;  %s38_s13 = sadd.s32 1, %s1516_s25 }
  0x17   : > { %p39_p12 = scmp.ge.s32.totalorder %s38_s13, 2  ;;  %s50_s14 = sadd.s32 1, %s1508_s23 }
  0x18   : > { %s239_s9 = sshll.u32 %s1803_s4, 4  ;;  %p1230_p11 = pnand %p1229_p10, %p64_p1  ;;  %s240_s9 = int_to_ptr.hbm [resolvable:$true] %s239_s9 }
  0x19   : > { %p57_p13 = scmp.ne.s32.totalorder %s1508_s23, %s1504_s22  ;;  %p58_p0 = scmp.eq.s32.totalorder %s1520_s26, 0 }
  0x1a   : > { %1232 = dma.hbm_to_vmem [thread:$0]  (!%p1230_p11), %s240_s9, 128, %s242_s12, [#allocation6]  }
  0x1b   : > { %s1820_s13 = smov (%p39_p12, %s38_s13), 0  ;;  %p1628_p3 = por %p58_p0, %p57_p13 }
  0x1c   : > { %1805 = sst [smem:[#allocation19_spill]] %s1820_s13  ;;  %p1634_p5 = por %p180_p2, %p57_p13 }
  0x1d   : > { %s46_s17 = ssub.s32 %s1516_s25, %s1820_s13  ;;  %p1248_p7 = scmp.lt.s32.totalorder %s1520_s26, 2 }
  0x1e   : > { %s1807_s16 = scalar_select %p1634_p5, 1, 0 }
  0x1f   : > { %p48_p10 = scmp.eq.s32.totalorder %s46_s17, 0  ;;  %s252_s18 = sand.u32 1, %s1508_s23  }
  0x20   : > { %1808 = sst [smem:[#allocation20_spill]] %s1807_s16  ;;  %s1201_s19 = sshll.u32 %s252_s18, 3 }
  0x21   : > { %s1643_s20 = scalar_select %p48_p10, %s1508_s23, %s50_s14  }
  0x22   : > { %s1202_s28 = sshll.u32 %s1516_s25, 3  ;;  %s256_s11 = scalar_lea.vmem [#allocation2], %s1201_s19 }
  0x23   : > { %1809 = sst [smem:[#allocation21_spill]] %s1643_s20  ;;  %s262_s9 = scalar_lea.hbm %s1784_s0, %s1202_s28 }
  0x24   : > { %s266_s12 = sshll.u32 %s256_s11, 4  ;;  %s264_s4 = sshll.u32 %s262_s9, 4  ;;  %s267_s12 = int_to_ptr.vmem [resolvable:$true] %s266_s12  ;;  %s265_s4 = int_to_ptr.hbm [resolvable:$true] %s264_s4 }
  0x25   : > { %p1234_p2 = pnand %p1248_p7, %p1628_p3  ;;  %s283_s17 = scalar_lea.hbm %s1785_s1, %s1202_s28 }
  0x26   : > { %s273_s21 = sand.u32 1, %s1520_s26   ;;  %s253_s16 = scalar_lea.sflag [#allocation3], %s252_s18 }
  0x27   : > { %1236 = dma.hbm_to_vmem [thread:$0]  (!%p1234_p2), %s265_s4, 128, %s267_s12, %s253_s16  }
  0x28   : > { %s285_s14 = sshll.u32 %s283_s17, 4  ;;  %s277_s25 = scalar_lea.vmem [#allocation5], %s1201_s19  ;;  %s286_s14 = int_to_ptr.hbm [resolvable:$true] %s285_s14 }
  0x29   : > { %s287_s20 = sshll.u32 %s277_s25, 4  ;;  %s274_s7 = scalar_lea.sflag [#allocation6], %s273_s21  ;;  %s288_s20 = int_to_ptr.vmem [resolvable:$true] %s287_s20 }
  0x2a   : > { %1239 = dma.hbm_to_vmem [thread:$0]  (!%p1234_p2), %s286_s14, 128, %s288_s20, %s274_s7  }
  0x2b   : > { %296 = sbr.rel (%p1612_p8) target bundleno = 293 (0x125), region = 40  ;;  %s1658_s15 = sand.u32 (!%p1612_p8), 1, %s1504_s22  }
  0x2c   : > { %s1661_s30 = sshll.u32 (!%p1612_p8), %s1658_s15, 3  ;;  %s299_s4 = scalar_lea.sflag (!%p1612_p8), [#allocation3], %s1658_s15 }
  0x2d   : > { %s302_s13 = scalar_lea.vmem (!%p1612_p8), [#allocation2], %s1661_s30 }
  0x30   : > { %1479 = dma.done.wait (%p1599_p4), %s299_s4, 128  }
  0x31   : > { %1481 = vsyncadd (%p1599_p4), %s299_s4, 4294967168  ;;  %s308_s21 = sand.u32 1, %s1590_s27   ;;  %s312_s10 = scalar_lea.vmem [#allocation5], %s1661_s30 }
  0x32   : > { %s309_s25 = scalar_lea.sflag [#allocation6], %s308_s21 }
  0x33   : > { %1483 = dma.done.wait (%p1599_p4), %s309_s25, 128  }
  0x34   : > { %1485 = vsyncadd (%p1599_p4), %s309_s25, 4294967168 }
  0x35   : > { %1487 = dma.done.wait (%p64_p1), [#allocation6], 128  }
  0x36   : > { %1489 = vsyncadd (%p64_p1), [#allocation6], 4294967168  ;;  %v1523_v0 = vmov 0   ;;  %vm368_vm0 = vcmask 64512   ;;  %v1679_v1 = vld [vmem:[%s302_s13] sm:$0xff]  ;;  %v1681_v2 = vld [vmem:[%s312_s10] sm:$0xff] }
  0x37   : > { %1301 = vset.pattern.permute.xlu0 %v1523_v0  ;;  %v359_v3 = vld [vmem:[%s1786_s2] sm:$0xff]  ;;  %v361_v4 = vsub.f32 %v1679_v1, %v1681_v2  ;;  %v539_v7 = vmul.f32 %v1681_v2, %v1679_v1  ;;  %v540_v9 = vmul.f32 %v1679_v1, %v1679_v1  ;;  %v541_v12 = vmul.f32 %v1681_v2, %v1681_v2  ;;  %s1213_s19 = sshll.u32 %s1512_s24, 3  ;;  %s349_s24 = scalar_lea.vmem [#allocation8], %s1661_s30 }
  0x38   : > { %v370_v5 = vsel %vm368_vm0, %v359_v3, 0  ;;  %v542_v6 = vld [vmem:[#allocation7] sm:$0xff]  ;;  %s1024_s8 = scalar_lea.hbm %s1789_s5, %s1213_s19  ;;  %s1040_s12 = scalar_lea.hbm %s1790_s6, %s1213_s19 }
  0x39   : > { %v360_v8 = vld [vmem:[%s1787_s3] sm:$0xff]  ;;  %v389_v10 = vand.u32 4294901760, %v370_v5  ;;  %v544_v11 = vsel %vm368_vm0, %v542_v6, 0  ;;  %v362_v13 = vand.u32 2147483647, %v361_v4  ;;  %v561_v15 = vand.u32 4294901760, %v539_v7 }
  0x3a   : > { %365 = vperm.xlu0 %1301, %v360_v8   ;;  %v1697_v14 = vand.u32 4294901760, %v544_v11  ;;  %v707_v17 = vand.u32 4294901760, %v540_v9  ;;  %v853_v21 = vand.u32 4294901760, %v541_v12  ;;  %s1724_s17 = sshll.u32 %s349_s24, 4  ;;  %s1028_s14 = sshll.u32 %s1024_s8, 4  ;;  %s1027_s17 = int_to_ptr.vmem [resolvable:$true] %s1724_s17  ;;  %s1029_s14 = int_to_ptr.hbm [resolvable:$true] %s1028_s14 }
  0x3b   : > { %v390_v16 = vsub.f32 %v370_v5, %v389_v10  ;;  %v387_v18 = vand.u32 4294901760, %v362_v13  ;;  %v588_v20 = vsub.f32 %v539_v7, %v561_v15  ;;  %s356_s4 = scalar_lea.vmem [#allocation9], %s1661_s30  ;;  %s1044_s21 = sshll.u32 %s1040_s12, 4  ;;  %s1733_s21 = int_to_ptr.hbm [resolvable:$true] %s1044_s21 }
  0x3c   : > { %v1700_v19 = vsub.f32 %v544_v11, %v1697_v14  ;;  %v734_v29 = vsub.f32 %v540_v9, %v707_v17  ;;  %v880_v30 = vsub.f32 %v541_v12, %v853_v21  ;;  %s1727_s13 = sshll.u32 %s356_s4, 4  ;;  %s1007_s25 = scalar_lea.sflag [#allocation4], %s1658_s15  ;;  %s1043_s13 = int_to_ptr.vmem [resolvable:$true] %s1727_s13 }
  0x3d   : > { %v391_v22 = vand.u32 4294901760, %v390_v16  ;;  %388 = vmatpush.msra.mxu0 %v387_v18  ;;  %v414_v23 = vsub.f32 %v362_v13, %v387_v18  ;;  %464 = vmatpush.msra.mxu3 %v387_v18  ;;  %v589_v24 = vand.u32 4294901760, %v588_v20  ;;  %s1412_s10 = sshra.s32 %s1029_s14, 4  ;;  %s1418_s27 = scalar_lea.hbm %s1789_s5, 16  ;;  %s1413_s10 = int_to_ptr.hbm [resolvable:$true] %s1412_s10 }
  0x3e   : > { %v565_v25 = vand.u32 4294901760, %v1700_v19  ;;  %v735_v36 = vand.u32 4294901760, %v734_v29  ;;  %v881_v37 = vand.u32 4294901760, %v880_v30  ;;  %s1414_s16 = scalar_lea.hbm %s1413_s10, 8  ;;  %p1419_p11 = scmp.lt.s32.totalorder %s1413_s10, %s1789_s5 }
  0x3f   : > { %v392_v26 = vsub.f32 %v390_v16, %v391_v22  ;;  %468 = vmatmul.f32.vlgmr.msra.gmra.mxu3 %v391_v22  ;;  %441 = vmatpush.msra.mxu2 %v414_v23  ;;  %v415_v27 = vand.u32 4294901760, %v414_v23  ;;  %v590_v28 = vsub.f32 %v588_v20, %v589_v24  ;;  %p1415_p1 = scmp.ne.s32.totalorder %s1413_s10, %s1414_s16  ;;  %p1420_p12 = scmp.lt.s32.totalorder %s1418_s27, %s1414_s16 }
  0x40   : > { %444 = vmatmul.f32.vlgmr.msra.gmra.mxu2 %v390_v16  ;;  %v566_v32 = vsub.f32 %v1700_v19, %v565_v25  ;;  %v736_v39 = vsub.f32 %v734_v29, %v735_v36  ;;  %v882_v40 = vsub.f32 %v880_v30, %v881_v37 }
  0x41   : > { %v393_v31 = vand.u32 4294901760, %v392_v26  ;;  %562 = vmatpush.msrb.mxu2 %v561_v15  ;;  %490 = vmatpush.msrb.mxu0 %v415_v27  ;;  %v591_v33 = vand.u32 4294901760, %v590_v28  ;;  %v416_v34 = vsub.f32 %v414_v23, %v415_v27  ;;  %p1416_p4 = pnand %p1415_p1, %p1634_p5  ;;  %p1421_p13 = por %p1420_p12, %p1419_p11 }
  0x42   : > { %v567_v38 = vand.u32 4294901760, %v566_v32  ;;  %v737_v41 = vand.u32 4294901760, %v736_v39  ;;  %v883_v42 = vand.u32 4294901760, %v882_v40 }
  0x43   : > { %394 = vmatmul.f32.vlgmr.msra.gmra.mxu0 %v393_v31  ;;  %664 = vmatpush.msra.mxu2 %v589_v24  ;;  %v417_v35 = vand.u32 4294901760, %v416_v34  ;;  %p1417_p8 = pneg %p1416_p4 }
  0x44   : > { %592 = vmatpush.msrb.mxu3 %v591_v33  ;;  %615 = vmatpush.msra.mxu0 %v588_v20 }
  0x45   : > { %418 = vmatpush.msra.mxu1 %v417_v35  ;;  %p1422_p0 = pnand %p1421_p13, %p1417_p8 }
  0x46   : > { %686 = vmatpush.msra.mxu3 %v561_v15  ;;  %420 = vmatmul.f32.vlgmr.msra.gmra.mxu1 %v389_v10 }
  0x47   : > { %594 = vmatmul.f32.vlgmr.msrb.gmra.mxu3 %v1697_v14  ;;  %512 = vmatpush.msrb.mxu1 %v387_v18 }
  0x48   : > { %784 = vmatpush.msrb.mxu3 %v707_v17  ;;  %568 = vmatmul.f32.vlgmr.msrb.gmra.mxu2 %v567_v38 }
  0x49   : > { %638 = vmatpush.msra.mxu1 %v561_v15  ;;  %761 = vmatpush.msrb.mxu2 %v734_v29 }
  0x4b   : > { %492 = vmatmul.f32.vlgmr.msrb.gmra.mxu0 %v389_v10 }
  0x4c   : > { %708 = vmatpush.msrb.mxu0 %v707_v17 }
  0x4e   : > { %514 = vmatmul.f32.vlgmr.msrb.gmra.mxu1 %v389_v10 }
  0x4f   : > { %688 = vmatmul.f32.vlgmr.msra.gmra.mxu3 %v1697_v14  ;;  %738 = vmatpush.msrb.mxu1 %v737_v41 }
  0x50   : > { %884 = vmatpush.msra.mxu3 %v883_v42  ;;  %666 = vmatmul.f32.vlgmr.msra.gmra.mxu2 %v1697_v14 }
  0x51   : > { %854 = vmatpush.msra.mxu2 %v853_v21 }
  0x53   : > { %618 = vmatmul.f32.vlgmr.msra.gmra.mxu0 %v1700_v19 }
  0x54   : > { %810 = vmatpush.msra.mxu0 %v735_v36 }
  0x56   : > { %642 = vmatmul.f32.vlgmr.msra.gmra.mxu1 %v565_v25 }
  0x57   : > { %788 = vmatmul.f32.vlgmr.msrb.gmra.mxu3 %v565_v25  ;;  %832 = vmatpush.msra.mxu1 %v707_v17 }
  0x58   : > { %978 = vmatpush.msrb.mxu3 %v853_v21  ;;  %764 = vmatmul.f32.vlgmr.msrb.gmra.mxu2 %v1700_v19 }
  0x59   : > { %956 = vmatpush.msrb.mxu2 %v881_v37 }
  0x5b   : > { %714 = vmatmul.f32.vlgmr.msrb.gmra.mxu0 %v567_v38 }
  0x5c   : > { %907 = vmatpush.msrb.mxu0 %v880_v30 }
  0x5e   : > { %740 = vmatmul.f32.vlgmr.msrb.gmra.mxu1 %v1697_v14 }
  0x5f   : > { %886 = vmatmul.f32.vlgmr.msra.gmra.mxu3 %v1697_v14  ;;  %930 = vmatpush.msrb.mxu1 %v853_v21 }
  0x60   : > { %860 = vmatmul.f32.vlgmr.msra.gmra.mxu2 %v567_v38 }
  0x63   : > { %812 = vmatmul.f32.vlgmr.msra.gmra.mxu0 %v1697_v14 }
  0x66   : > { %834 = vmatmul.f32.vlgmr.msra.gmra.mxu1 %v1697_v14 }
  0x67   : > { %980 = vmatmul.f32.vlgmr.msrb.gmra.mxu3 %v1697_v14 }
  0x68   : > { %958 = vmatmul.f32.vlgmr.msrb.gmra.mxu2 %v1697_v14 }
  0x6b   : > { %910 = vmatmul.f32.vlgmr.msrb.gmra.mxu0 %v1700_v19 }
  0x6e   : > { %934 = vmatmul.f32.vlgmr.msrb.gmra.mxu1 %v565_v25 }
  0xac   : > { %v366_v43 = vpop.permute.xlu0 %365 }
  0xc0   : > { %v395_v44 = vpop.f32.mrf.mxu0 }
  0xc1   : > { %v396_v45 = vadd.f32 %v395_v44, %v366_v43 }
  0xc2   : > { %v469_v46 = vpop.f32.mrf.mxu3 }
  0xc3   : > { %v421_v47 = vpop.f32.mrf.mxu1  ;;  %v445_v48 = vpop.f32.mrf.mxu2 }
  0xc4   : > { %v422_v49 = vadd.f32 %v421_v47, %v396_v45 }
  0xc6   : > { %v446_v51 = vadd.f32 %v445_v48, %v422_v49 }
  0xc8   : > { %v493_v50 = vpop.f32.mrf.mxu0  ;;  %v470_v55 = vadd.f32 %v469_v46, %v446_v51 }
  0xca   : > { %v595_v52 = vpop.f32.mrf.mxu3  ;;  %v494_v57 = vadd.f32 %v493_v50, %v470_v55 }
  0xcb   : > { %v515_v53 = vpop.f32.mrf.mxu1  ;;  %v569_v54 = vpop.f32.mrf.mxu2 }
  0xcc   : > { %v516_v61 = vadd.f32 %v515_v53, %v494_v57  ;;  %v596_v30 = vadd.f32 %v595_v52, %v569_v54 }
  0xce   : > { %v519_v63 = vmul.f32 0.01, %v516_v61  ;;  %vm518_vm1 = vcmp.ge.f32.partialorder %v516_v61, 0.0 }
  0xd0   : > { %v619_v56 = vpop.f32.mrf.mxu0  ;;  %v520_v5 = vsel %vm518_vm1, %v516_v61, %v519_v63 }
  0xd1   : > { %v521_v7 = vsub.f32 0.0, %v520_v5  ;;  %v620_v33 = vadd.f32 %v619_v56, %v596_v30 }
  0xd2   : > { %v689_v58 = vpop.f32.mrf.mxu3 }
  0xd3   : > { %v643_v59 = vpop.f32.mrf.mxu1  ;;  %v667_v60 = vpop.f32.mrf.mxu2  ;;  %v522_v12 = vmul.f32 1.442695, %v521_v7 }
  0xd4   : > { %v644_v36 = vadd.f32 %v643_v59, %v620_v33 }
  0xd5   : > { %1302 = vpow2.f32 %v522_v12 }
  0xd6   : > { %v668_v40 = vadd.f32 %v667_v60, %v644_v36 }
  0xd8   : > { %v715_v62 = vpop.f32.mrf.mxu0  ;;  %v690_v43 = vadd.f32 %v689_v58, %v668_v40 }
  0xda   : > { %v789_v0 = vpop.f32.mrf.mxu3 }
  0xdb   : > { %v741_v3 = vpop.f32.mrf.mxu1  ;;  %v765_v4 = vpop.f32.mrf.mxu2 }
  0xdc   : > { %v742_v8 = vadd.f32 %v741_v3, %v715_v62  ;;  %v1303_v23 = vpop.eup %1302 }
  0xdd   : > { %v524_v27 = vadd.f32 1.0, %v1303_v23 }
  0xde   : > { %v766_v13 = vadd.f32 %v765_v4, %v742_v8 }
  0xdf   : > { %1304 = vrcp.f32 %v524_v27  ;;  %v536_v49 = vand.u32 2147483648, %v524_v27  ;;  %vm530_vm6 = vweird.f32 %v524_v27  ;;  %v534_v51 = vand.u32 2147483647, %v524_v27 }
  0xe0   : > { %v813_v6 = vpop.f32.mrf.mxu0  ;;  %v790_v16 = vadd.f32 %v789_v0, %v766_v13 }
  0xe1   : > { %v537_v54 = vor.u32 1.1754944e-38, %v536_v49  ;;  %vm535_vm8 = vcmp.eq.f32.partialorder %v534_v51, 8.507059e+37 }
  0xe2   : > { %v887_v9 = vpop.f32.mrf.mxu3  ;;  %v814_v20 = vadd.f32 %v813_v6, %v790_v16 }
  0xe3   : > { %v835_v10 = vpop.f32.mrf.mxu1  ;;  %v861_v11 = vpop.f32.mrf.mxu2 }
  0xe4   : > { %v888_v14 = vadd.f32 %v887_v9, %v861_v11  ;;  %v836_v25 = vadd.f32 %v835_v10, %v814_v20 }
  0xe5   : > { %v1305_v31 = vpop.eup %1304 }
  0xe6   : > { %v526_v35 = vmul.f32 %v1305_v31, %v524_v27  ;;  %vm531_vm5 = vweird.f32 %v1305_v31 }
  0xe7   : > { %vm532_vm7 = vmor %vm530_vm6, %vm531_vm5 }
  0xe8   : > { %v911_v15 = vpop.f32.mrf.mxu0  ;;  %v527_v39 = vsub.f32 1.0, %v526_v35 }
  0xe9   : > { %v912_v17 = vadd.f32 %v911_v15, %v888_v14 }
  0xea   : > { %v981_v22 = vpop.f32.mrf.mxu3  ;;  %v528_v44 = vmul.f32 %v1305_v31, %v527_v39 }
  0xeb   : > { %v935_v18 = vpop.f32.mrf.mxu1  ;;  %v959_v19 = vpop.f32.mrf.mxu2 }
  0xec   : > { %v936_v21 = vadd.f32 %v935_v18, %v912_v17  ;;  %v529_v48 = vadd.f32 %v1305_v31, %v528_v44 }
  0xee   : > { %v960_v24 = vadd.f32 %v959_v19, %v936_v21  ;;  %v533_v53 = vsel %vm532_vm7, %v1305_v31, %v529_v48 }
  0xef   : > { %v538_v56 = vsel %vm535_vm8, %v537_v54, %v533_v53 }
  0xf0   : > { %v982_v26 = vadd.f32 %v981_v22, %v960_v24 }
  0xf2   : > { %v984_v28 = vmul.f32 %v982_v26, %v836_v25 }
  0xf4   : > { %v985_v29 = vadd.f32 1e-16, %v984_v28 }
  0xf6   : > { %1306 = vrsqrt.f32 %v985_v29  ;;  %vm992_vm3 = vweird.f32 %v985_v29 }
  0xfc   : > { %v1307_v32 = vpop.eup %1306 }
  0xfd   : > { %v987_v34 = vmul.f32 %v1307_v32, %v985_v29  ;;  %vm993_vm2 = vweird.f32 %v1307_v32 }
  0xfe   : > { %vm994_vm4 = vmor %vm992_vm3, %vm993_vm2 }
  0xff   : > { %v988_v37 = vmul.f32 %v1307_v32, %v987_v34 }
 0x101   : > { %v989_v38 = vmul.f32 0.5, %v988_v37 }
 0x103   : > { %v990_v41 = vsub.f32 1.5, %v989_v38 }
 0x105   : > { %v991_v42 = vmul.f32 %v1307_v32, %v990_v41 }
 0x107   : > { %v995_v45 = vsel %vm994_vm4, %v1307_v32, %v991_v42 }
 0x108   : > { %v996_v46 = vmul.f32 %v995_v45, %v690_v43 }
 0x10a   : > { %v997_v47 = vadd.f32 1.0, %v996_v46 }
 0x10c   : > { %v998_v50 = vmul.f32 0.5, %v997_v47 }
 0x10e   : > { %v999_v52 = vsub.f32 1.0, %v998_v50 }
 0x110   : > { %v1000_v55 = vmul.f32 %v999_v52, %v998_v50 }
 0x112   : > { %v1001_v57 = vmul.f32 %v1000_v55, %v538_v56 }
 0x114   : > { %v1002_v58 = vmul.f32 %v1001_v57, %v1679_v1  ;;  %v1004_v59 = vmul.f32 %v1001_v57, %v1681_v2 }
 0x116   : > { %1003 = vst [vmem:[%s349_s24] sm:$0xff] %v1002_v58 }
 0x117   : > { %1425 = shalt.err (!%p1422_p0)
}
 0x118   : > { %1225 = dma.vmem_to_hbm [thread:$0]  (%p1634_p5), %s1027_s17, 128, %s1029_s14, %s1007_s25   ;;  %1005 = vst [vmem:[%s356_s4] sm:$0xff] %v1004_v59 }
 0x119   : > { %s1012_s20 = scalar_lea.sflag [#allocation10], %s1658_s15  ;;  %s1440_s28 = sshra.s32 %s1733_s21, 4  ;;  %s1441_s28 = int_to_ptr.hbm [resolvable:$true] %s1440_s28 }
 0x11a   : > { %s1442_s8 = scalar_lea.hbm %s1441_s28, 8  ;;  %s1446_s12 = scalar_lea.hbm %s1790_s6, 16 }
 0x11b   : > { %p1443_p3 = scmp.ne.s32.totalorder %s1441_s28, %s1442_s8  ;;  %p1447_p2 = scmp.lt.s32.totalorder %s1441_s28, %s1790_s6 }
 0x11c   : > { %p1448_p1 = scmp.lt.s32.totalorder %s1446_s12, %s1442_s8 }
 0x11d   : > { %p1444_p7 = pnand %p1443_p3, %p1634_p5 }
 0x11e   : > { %p1449_p4 = por %p1448_p1, %p1447_p2 }
 0x11f   : > { %p1445_p10 = pneg %p1444_p7 }
 0x121   : > { %p1450_p8 = pnand %p1449_p4, %p1445_p10 }
 0x123   : > { %1453 = shalt.err (!%p1450_p8)
}
 0x124   : > { %1226 = dma.vmem_to_hbm [thread:$0]  (%p1634_p5), %s1043_s13, 128, %s1733_s21, %s1012_s20  }
 0x125 PF: > { %s1811_s15 = sld [smem:[#allocation16_spill]]  ;;  %p1241_p11 = pnand %p1200_p9, %p1604_p6 }
 0x127   : > { %p1242_p12 = pneg %p1241_p11 }
 0x12b   : > { %s1056_s14 = sand.u32 1, %s1811_s15  }
 0x12c   : > { %s1057_s4 = scalar_lea.sflag [#allocation4], %s1056_s14 }
 0x12d   : > { %1491 = dma.done.wait (%p1242_p12), %s1057_s4, 128  }
 0x12e   : > { %1493 = vsyncadd (%p1242_p12), %s1057_s4, 4294967168  ;;  %s1067_s25 = scalar_lea.sflag [#allocation10], %s1056_s14 }
 0x12f   : > { %1495 = dma.done.wait (%p1242_p12), %s1067_s25, 128  }
 0x130   : > { %1497 = vsyncadd (%p1242_p12), %s1067_s25, 4294967168  ;;  %s29_s26 = sadd.s32 1, %s1520_s26   ;;  %s1813_s7 = sld [smem:[#allocation21_spill]] }
 0x131   : > { %p26_p13 = scmp.ge.s32.totalorder %s29_s26, 4   ;;  %s1814_s24 = sld [smem:[#allocation17_spill]] }
 0x132   : > { %s1815_s25 = sld [smem:[#allocation19_spill]]  ;;  %s1816_s21 = smov %s1504_s22 }
 0x133   : > { %s1817_s22 = smov %s1508_s23  ;;  %28 = sbr.rel (!%p26_p13) target bundleno = 12 (0xc), region = 119 }
 0x136   : > { %s1818_s23 = smov %s1813_s7 }
 0x138   :  { %1073 = vsyncpa [#allocation3], 1 }
 0x139   :  { %1075 = vsyncpa [#allocation3 + $0x1], 1 }
 0x13a   :  { %1076 = vsyncpa [#allocation6], 1 }
 0x13b   :  { %1078 = vsyncpa [#allocation6 + $0x1], 1 }
 0x13c   :  { %1079 = vsyncpa [#allocation4], 1 }
 0x13d   :  { %1081 = vsyncpa [#allocation4 + $0x1], 1 }
 0x13e   :  { %1082 = vsyncpa [#allocation10], 1 }
 0x13f   :  { %1084 = vsyncpa [#allocation10 + $0x1], 1 }

</bundles_post_ra>
